<compile_context>
chip_gen: v6e
topology: v6e:2x2x1
jax: 0.10.0
libtpu: 0.0.40
codegen_flags: <defaults>
</compile_context>

<pallas_src>
import jax
import jax.numpy as jnp
from jax.experimental import pallas as pl
from jax.experimental.pallas import tpu as pltpu


def _linear_softmax_kernel(x_ref, wt_ref, o_ref):
    # x_ref : (TB, K) — one batch tile of activations (double-buffered stream)
    # wt_ref: (K, N)  — transposed weight, resident across the grid
    # o_ref : (TB, N) — softmax probabilities, written back contiguously
    logits = jnp.dot(x_ref[...], wt_ref[...],
                     preferred_element_type=jnp.float32)       # (TB, N), MXU-natural
    lt = logits.T                                              # (N, TB) tiny XLU flip
    m = jnp.max(lt, axis=0, keepdims=True)                     # (1, TB)
    e = jnp.exp(lt - m)                                        # lane-dense EUP work
    probs_t = e / jnp.sum(e, axis=0, keepdims=True)            # exact normalization
    o_ref[...] = probs_t.T.astype(o_ref.dtype)                 # back to (TB, N)


def net_forward(x, weight, *, tb=4096):
    """x: (B, 300), weight: (4, 300) (PyTorch nn.Linear layout, bias=False).

    Returns softmax(x @ weight.T, axis=-1) as (B, 4) float32.
    """
    B, K = x.shape
    N, K2 = weight.shape
    assert K == K2, "x / weight feature dims must match"

    # Small batches: one full-array block (full-dim blocks satisfy tiling rules).
    # Large batches: tb-row tiles (multiple of 8/128) -> pipelined x stream.
    TB = B if B <= tb else tb
    grid = (pl.cdiv(B, TB),)

    w_t = weight.T  # (K, N): one-time 4.8 KB transpose; MXU-natural RHS layout.

    return pl.pallas_call(
        _linear_softmax_kernel,
        out_shape=jax.ShapeDtypeStruct((B, N), jnp.float32),
        grid=grid,
        in_specs=[
            pl.BlockSpec((TB, K), lambda i: (i, 0)),   # batch-tiled, double-buffered
            pl.BlockSpec((K, N), lambda i: (0, 0)),    # weight stays resident
        ],
        out_specs=pl.BlockSpec((TB, N), lambda i: (i, 0)),  # direct (B, N) output
        compiler_params=pltpu.CompilerParams(
            dimension_semantics=("parallel",)),
    )(x, w_t)


def _reference(x, weight):
    return jax.nn.softmax(x @ weight.T, axis=-1)


if __name__ == "__main__":
    key = jax.random.PRNGKey(0)
    kx, kw, kx2 = jax.random.split(key, 3)

    B, IN, OUT = 8, 300, 4
    x = jax.random.normal(kx, (B, IN), dtype=jnp.float32)
    # Deterministic init mimicking nn.Linear's U(-1/sqrt(in), 1/sqrt(in))
    bound = 1.0 / jnp.sqrt(jnp.float32(IN))
    weight = jax.random.uniform(kw, (OUT, IN), dtype=jnp.float32,
                                minval=-bound, maxval=bound)

    # Small-batch path (single block).
    out = jax.block_until_ready(net_forward(x, weight))
    ref = _reference(x, weight)
    assert out.shape == (B, OUT)
    assert bool(jnp.all(jnp.abs(jnp.sum(out, axis=-1) - 1.0) < 1e-3))
    assert bool(jnp.max(jnp.abs(out - ref)) < 5e-3)

    # Tiled path with a remainder tile (grid > 1 + Pallas block masking).
    B2 = 272
    x2 = jax.random.normal(kx2, (B2, IN), dtype=jnp.float32)
    out2 = jax.block_until_ready(net_forward(x2, weight, tb=128))
    ref2 = _reference(x2, weight)
    assert out2.shape == (B2, OUT)
    assert bool(jnp.all(jnp.abs(jnp.sum(out2, axis=-1) - 1.0) < 1e-3))
    assert bool(jnp.max(jnp.abs(out2 - ref2)) < 5e-3)

    print("KERNEL_OK")
</pallas_src>

<mosaic_0001>
module attributes {stable_mosaic.version = 11 : i64} {
  func.func @_linear_softmax_kernel(%arg0: i32, %arg1: memref<8x300xf32, #tpu.memory_space<vmem>>, %arg2: memref<300x4xf32, #tpu.memory_space<vmem>>, %arg3: memref<8x4xf32, #tpu.memory_space<vmem>>) attributes {dimension_semantics = [#tpu.dimension_semantics<parallel>], iteration_bounds = array<i64: 1>, scalar_prefetch = 0 : i64, scratch_operands = 0 : i64, tpu.core_type = #tpu.core_type<tc>, window_params = [{transform_indices = @transform_0, window_bounds = array<i64: 8, 300>}, {pipeline_mode = #tpu.pipeline_mode<synchronous>, transform_indices = @transform_1, window_bounds = array<i64: 300, 4>}, {transform_indices = @transform_2, window_bounds = array<i64: 8, 4>}]} {
    %c0 = arith.constant 0 : index
    %c0_0 = arith.constant 0 : index
    %0 = vector.load %arg1[%c0, %c0_0] : memref<8x300xf32, #tpu.memory_space<vmem>>, vector<8x300xf32>
    %c0_1 = arith.constant 0 : index
    %c0_2 = arith.constant 0 : index
    %1 = vector.load %arg2[%c0_1, %c0_2] : memref<300x4xf32, #tpu.memory_space<vmem>>, vector<300x4xf32>
    %cst = arith.constant dense<0.000000e+00> : vector<8x4xf32>
    %2 = tpu.matmul %0, %1, %cst {dimension_numbers = #tpu.dot_dimension_numbers<[1], [0], [0], [1], [0, 0, 1, 1], [], []>} : vector<8x300xf32>, vector<300x4xf32>, vector<8x4xf32> -> vector<8x4xf32>
    %3 = tpu.transpose %2, [1, 0] : vector<8x4xf32> -> vector<4x8xf32>
    %cst_3 = arith.constant dense<0xFF800000> : vector<8xf32>
    %4 = vector.multi_reduction <maximumf>, %3, %cst_3 [0] : vector<4x8xf32> to vector<8xf32>
    %5 = vector.shape_cast %4 : vector<8xf32> to vector<1x8xf32>
    %6 = vector.broadcast %5 : vector<1x8xf32> to vector<4x8xf32>
    %7 = arith.subf %3, %6 : vector<4x8xf32>
    %8 = math.exp %7 : vector<4x8xf32>
    %cst_4 = arith.constant dense<0.000000e+00> : vector<8xf32>
    %9 = vector.multi_reduction <add>, %8, %cst_4 [0] : vector<4x8xf32> to vector<8xf32>
    %10 = vector.shape_cast %9 : vector<8xf32> to vector<1x8xf32>
    %11 = vector.broadcast %10 : vector<1x8xf32> to vector<4x8xf32>
    %12 = arith.divf %8, %11 : vector<4x8xf32>
    %13 = tpu.transpose %12, [1, 0] : vector<4x8xf32> -> vector<8x4xf32>
    %c0_5 = arith.constant 0 : index
    %c0_6 = arith.constant 0 : index
    %14 = vector.load %arg3[%c0_5, %c0_6] : memref<8x4xf32, #tpu.memory_space<vmem>>, vector<8x4xf32>
    tpu.vector_store %arg3[%c0_5, %c0_6], %13 {strides = array<i32>} : memref<8x4xf32, #tpu.memory_space<vmem>>, vector<8x4xf32>,
    return
  }
  func.func @transform_0(%arg0: i32) -> (i32, i32) {
    %c0_i32 = arith.constant 0 : i32
    %c0_i32_0 = arith.constant 0 : i32
    return %arg0, %c0_i32 : i32, i32
  }
  func.func @transform_1(%arg0: i32) -> (i32, i32) {
    %c0_i32 = arith.constant 0 : i32
    %c0_i32_0 = arith.constant 0 : i32
    %c0_i32_1 = arith.constant 0 : i32
    return %c0_i32, %c0_i32_0 : i32, i32
  }
  func.func @transform_2(%arg0: i32) -> (i32, i32) {
    %c0_i32 = arith.constant 0 : i32
    %c0_i32_0 = arith.constant 0 : i32
    return %arg0, %c0_i32 : i32, i32
  }
}

</mosaic_0001>

<bundles_post_ra>
// kernel: tpu_custom_call.1
= control target key start
LH: loop header
LB: loop body
LE: loop exit
PB: predicated region body
PF: predicated region fallthrough
CT: control target
= control target key end

     0   :  { %v355_v3 = vmov 0.0   ;;  %vm356_vm0 = vmmov 0   ;;  %vm56_vm1 = vcmask 1043456   ;;  %vm52_vm2 = vcmask 359424   ;;  %s498_s1 = inlined_call_operand.vmem [shape: f32[300,4], index: 1, kind: input, shape index: {}]   ;;  %s499_s0 = inlined_call_operand.vmem [shape: f32[8,300], index: 0, kind: input, shape index: {}]   ;;  %s500_s2 = inlined_call_operand.vmem [shape: f32[8,4], index: 2, kind: output, shape index: {}]  }
   0x1   :  { %v45_v0 = vld [vmem:[%s498_s1 + $0xf8] sm:$0xff]  ;;  %v44_v2 = vld [vmem:[%s498_s1 + $0xf0] sm:$0xff]  ;;  %334 = vmatprep.subr.mxu1 %v355_v3  ;;  %346 = vmatprep.mubr.msk.f32.mxu1 %vm356_vm0, %v355_v3  ;;  %v43_v5 = vld [vmem:[%s498_s1 + $0xe8] sm:$0xff]  ;;  %vm232_vm3 = vcmask 60416   ;;  %vm284_vm4 = vcmask 31744  }
   0x2   :  { %v29_v1 = vld [vmem:[%s498_s1 + $0x78] sm:$0xff]  ;;  %292 = vmatprep.subr.mxu0 %v45_v0  ;;  %v28_v4 = vld [vmem:[%s498_s1 + $0x70] sm:$0xff]  ;;  %v27_v6 = vld [vmem:[%s498_s1 + $0x68] sm:$0xff] }
   0x3   :  { %293 = vmatpush3.msra.mxu0 %v29_v1  ;;  %v42_v7 = vld [vmem:[%s498_s1 + $0xe0] sm:$0xff]  ;;  %v41_v9 = vld [vmem:[%s498_s1 + $0xd8] sm:$0xff]  ;;  %v40_v11 = vld [vmem:[%s498_s1 + $0xd0] sm:$0xff] }
   0x4   :  { %294 = vmatprep.subr.mxu0 %v44_v2  ;;  %v26_v8 = vld [vmem:[%s498_s1 + $0x60] sm:$0xff]  ;;  %v25_v10 = vld [vmem:[%s498_s1 + $0x58] sm:$0xff]  ;;  %v51_v12 = vld [vmem:[%s498_s1 + $0x128] sm:$0xf] }
   0x5   :  { %295 = vmatpush3.msra.mxu0 %v28_v4  ;;  %v24_v13 = vld [vmem:[%s498_s1 + $0x50] sm:$0xff]  ;;  %335 = vmatpush3.msk.msra.mxu1 %vm56_vm1, %v51_v12  ;;  %v50_v14 = vld [vmem:[%s498_s1 + $0x120] sm:$0xff]  ;;  %v39_v15 = vld [vmem:[%s498_s1 + $0xc8] sm:$0xff] }
   0x6   :  { %296 = vmatprep.subr.mxu0 %v43_v5  ;;  %336 = vmatprep.subr.mxu1 %v355_v3  ;;  %v49_v16 = vld [vmem:[%s498_s1 + $0x118] sm:$0xff]  ;;  %v23_v17 = vld [vmem:[%s498_s1 + $0x48] sm:$0xff]  ;;  %v38_v18 = vld [vmem:[%s498_s1 + $0xc0] sm:$0xff] }
   0x7   :  { %297 = vmatpush3.msra.mxu0 %v27_v6  ;;  %337 = vmatpush3.msra.mxu1 %v50_v14  ;;  %v48_v19 = vld [vmem:[%s498_s1 + $0x110] sm:$0xff]  ;;  %v22_v20 = vld [vmem:[%s498_s1 + $0x40] sm:$0xff]  ;;  %v37_v21 = vld [vmem:[%s498_s1 + $0xb8] sm:$0xff] }
   0x8   :  { %298 = vmatprep.subr.mxu0 %v42_v7  ;;  %338 = vmatprep.subr.mxu1 %v355_v3  ;;  %v12_v22 = vld [vmem:[%s499_s0 + $0x8] sm:$0xff]  ;;  %v21_v23 = vld [vmem:[%s498_s1 + $0x38] sm:$0xff]  ;;  %v36_v25 = vld [vmem:[%s498_s1 + $0xb0] sm:$0xff] }
   0x9   :  { %299 = vmatpush3.msra.mxu0 %v26_v8  ;;  %339 = vmatpush3.msra.mxu1 %v49_v16  ;;  %v47_v24 = vld [vmem:[%s498_s1 + $0x108] sm:$0xff]  ;;  %v20_v26 = vld [vmem:[%s498_s1 + $0x30] sm:$0xff]  ;;  %v46_v27 = vld [vmem:[%s498_s1 + $0x100] sm:$0xff] }
   0xa   :  { %300 = vmatprep.subr.mxu0 %v41_v9  ;;  %340 = vmatprep.subr.mxu1 %v355_v3  ;;  %v35_v28 = vld [vmem:[%s498_s1 + $0xa8] sm:$0xff]  ;;  %v13_v29 = vld [vmem:[%s499_s0 + $0x10] sm:$0xff]  ;;  %v34_v31 = vld [vmem:[%s498_s1 + $0xa0] sm:$0xff] }
   0xb   :  { %301 = vmatpush3.msra.mxu0 %v25_v10  ;;  %341 = vmatpush3.msra.mxu1 %v48_v19  ;;  %v19_v30 = vld [vmem:[%s498_s1 + $0x28] sm:$0xff]  ;;  %v18_v32 = vld [vmem:[%s498_s1 + $0x20] sm:$0xff]  ;;  %v33_v33 = vld [vmem:[%s498_s1 + $0x98] sm:$0xff] }
   0xc   :  { %302 = vmatprep.subr.mxu0 %v40_v11  ;;  %342 = vmatprep.subr.mxu1 %v355_v3  ;;  %v17_v34 = vld [vmem:[%s498_s1 + $0x18] sm:$0xff]  ;;  %v32_v35 = vld [vmem:[%s498_s1 + $0x90] sm:$0xff]  ;;  %v31_v37 = vld [vmem:[%s498_s1 + $0x88] sm:$0xff] }
   0xd   :  { %303 = vmatpush3.msra.mxu0 %v24_v13  ;;  %124 = vmatprep.mubr.f32.mxu0 %v12_v22  ;;  %v16_v36 = vld [vmem:[%s498_s1 + $0x10] sm:$0xff]  ;;  %v15_v38 = vld [vmem:[%s498_s1 + $0x8] sm:$0xff]  ;;  %v30_v39 = vld [vmem:[%s498_s1 + $0x80] sm:$0xff] }
   0xe   :  { %304 = vmatprep.subr.mxu0 %v39_v15  ;;  %343 = vmatpush3.msra.mxu1 %v47_v24  ;;  %v14_v40 = vld [vmem:[%s498_s1] sm:$0xff] }
   0xf   :  { %305 = vmatpush3.msra.mxu0 %v23_v17  ;;  %344 = vmatprep.subr.mxu1 %v355_v3  ;;  %v11_v41 = vld [vmem:[%s499_s0] sm:$0xff] }
  0x10   :  { %306 = vmatprep.subr.mxu0 %v38_v18  ;;  %345 = vmatpush3.msra.mxu1 %v46_v27 }
  0x11   :  { %307 = vmatpush3.msra.mxu0 %v22_v20  ;;  %347 = vmatmul.mubr.msk.f32.vlgmr.msra.gmra.mxu1 %vm52_vm2, %v13_v29 }
  0x12   :  { %308 = vmatprep.subr.mxu0 %v37_v21 }
  0x13   :  { %309 = vmatpush3.msra.mxu0 %v21_v23 }
  0x14   :  { %310 = vmatprep.subr.mxu0 %v36_v25 }
  0x15   :  { %311 = vmatpush3.msra.mxu0 %v20_v26 }
  0x16   :  { %312 = vmatprep.subr.mxu0 %v35_v28 }
  0x17   :  { %313 = vmatpush3.msra.mxu0 %v19_v30 }
  0x18   :  { %314 = vmatprep.subr.mxu0 %v34_v31 }
  0x19   :  { %315 = vmatpush3.msra.mxu0 %v18_v32 }
  0x1a   :  { %316 = vmatprep.subr.mxu0 %v33_v33 }
  0x1b   :  { %317 = vmatpush3.msra.mxu0 %v17_v34 }
  0x1c   :  { %318 = vmatprep.subr.mxu0 %v32_v35 }
  0x1d   :  { %319 = vmatpush3.msra.mxu0 %v16_v36 }
  0x1e   :  { %320 = vmatprep.subr.mxu0 %v31_v37 }
  0x1f   :  { %321 = vmatpush3.msra.mxu0 %v15_v38 }
  0x20   :  { %322 = vmatprep.subr.mxu0 %v30_v39 }
  0x21   :  { %323 = vmatpush3.msra.mxu0 %v14_v40 }
  0x22   :  { %125 = vmatmul.mubr.f32.vlgmr.msra.gmra.mxu0 %v11_v41 }
  0xd1   :  { %v196_v42 = vpop.f32.mrf.mxu1 }
  0xd3   :  { %v348_v43 = vpop.f32.mrf.mxu1 }
  0xe2   :  { %v324_v44 = vpop.f32.mrf.mxu0 }
  0xe4   :  { %v325_v45 = vpop.f32.mrf.mxu0 }
  0xe5   :  { %v326_v46 = vadd.f32 %v325_v45, %v324_v44 }
  0xe7   :  { %v197_v47 = vadd.f32 %v326_v46, %v196_v42 }
  0xe9   :  { %200 = vxpose.xlu0.b32.start.end [1/1] (short) (narrow) %v197_v47, 8 }
 0x165   :  { %v216_v48 = vpop.trf.xlu0 }
 0x166   :  { %v233_v49 = vsel %vm232_vm3, %v216_v48, -inf }
 0x167   :  { %v234_v50 = vrot.slane %v233_v49, 4 }
 0x169   :  { %v235_v51 = vmax.f32 %v233_v49, %v234_v50 }
 0x16b   :  { %v236_v52 = vrot.slane %v235_v51, 2 }
 0x16d   :  { %v237_v53 = vmax.f32 %v235_v51, %v236_v52 }
 0x16f   :  { %v238_v54 = vrot.slane %v237_v53, 1 }
 0x171   :  { %v239_v55 = vmax.f32 %v237_v53, %v238_v54 }
 0x173   :  { %v240_v56 = vsub.f32 %v216_v48, %v239_v55 }
 0x175   :  { %v241_v57 = vmul.f32 1.442695, %v240_v56 }
 0x177   :  { %351 = vpow2.f32 %v241_v57 }
 0x184   :  { %v352_v58 = vpop.eup %351 }
 0x185   :  { %v243_v59 = vsel %vm232_vm3, %v352_v58, 0.0 }
 0x186   :  { %v244_v60 = vrot.slane %v243_v59, 4 }
 0x188   :  { %v245_v61 = vadd.f32 %v244_v60, %v243_v59 }
 0x18a   :  { %v246_v62 = vrot.slane %v245_v61, 2 }
 0x18c   :  { %v247_v63 = vadd.f32 %v246_v62, %v245_v61 }
 0x18e   :  { %v248_v0 = vrot.slane %v247_v63, 1 }
 0x190   :  { %v249_v1 = vadd.f32 %v248_v0, %v247_v63 }
 0x192   :  { %353 = vrcp.f32 %v249_v1 }
 0x19f   :  { %v354_v2 = vpop.eup %353 }
 0x1a0   :  { %v251_v3 = vmul.f32 %v354_v2, %v352_v58 }
 0x1a2   :  { %252 = vxpose.xlu0.b32.start.end [1/1] (short) (narrow) %v251_v3, 8 }
 0x21e   :  { %v268_v4 = vpop.trf.xlu0 }
 0x21f   :  { %285 = vst.msk [vmem:[%s500_s2] sm:$0xff] %vm284_vm4, %v268_v4 }

</bundles_post_ra>
